<compile_context>
chip_gen: v7x
topology: tpu7x:2x2x1
jax: 0.10.0
libtpu: 0.0.40
codegen_flags: <defaults>
</compile_context>

<pallas_src>
import jax
import jax.numpy as jnp
from jax.experimental import pallas as pl
from jax.experimental.pallas import tpu as pltpu


_INV_SQRT2 = 0.7071067811865476


def _round_up(a, b):
    return (a + b - 1) // b * b


def _largest_tile(dim, requested, unit=128):
    """Largest multiple of `unit` that divides `dim` and is <= requested.

    Falls back to `dim` itself (single chunk) if no such tile exists
    (e.g. dim < unit), never to a silent VMEM-blowing over-size.
    """
    t = (min(requested, dim) // unit) * unit
    while t >= unit:
        if dim % t == 0:
            return t
        t -= unit
    return dim


def _const_spec(block_shape, index_map):
    """Spec for a parameter whose block index is constant over the whole grid.

    Single-buffer it (pl.Buffered(1)) when the running JAX supports the
    pipeline_mode kwarg: the second pipeline buffer is pure VMEM waste for
    resident weights (matters at real Whisper sizes: D=1280, Dh=5120,
    especially on v7x's 64 MiB per-TensorCore VMEM).
    """
    try:
        return pl.BlockSpec(block_shape, index_map, pipeline_mode=pl.Buffered(1))
    except (AttributeError, TypeError):
        return pl.BlockSpec(block_shape, index_map)


def _gelu_erf(h1):
    # Exact-erf GELU, f32, matching PyTorch nn.GELU() default.
    return 0.5 * h1 * (1.0 + jax.lax.erf(h1 * _INV_SQRT2))


# ---------------------------------------------------------------------------
# Resident-weights kernel: whole W1/W2 live in VMEM; one grid axis over rows.
# LayerNorm + fc1 + GELU + fc2 fully fused; Dh chunked inside the kernel.
# ---------------------------------------------------------------------------
def _make_resident_kernel(tc, n_chunks):
    def kernel(x_ref, g_ref, be_ref, w1_ref, b1_ref, w2_ref, b2_ref, o_ref):
        # LayerNorm over last dim (PyTorch eps=1e-5, biased variance), in f32.
        x = x_ref[...].astype(jnp.float32)                        # (tm, D)
        mean = jnp.mean(x, axis=-1, keepdims=True)
        var = jnp.mean((x - mean) ** 2, axis=-1, keepdims=True)
        h = (x - mean) * jax.lax.rsqrt(var + 1e-5)
        h = h * g_ref[...].astype(jnp.float32) + be_ref[...].astype(jnp.float32)
        h = h.astype(w1_ref.dtype)                                # bf16 for MXU

        def fc_block(w1c, b1c, w2c):
            # fc1 chunk: (tm, D) @ (D, tc) -> f32, bias, exact GELU.
            h1 = jnp.dot(h, w1c, preferred_element_type=jnp.float32)
            h1 = _gelu_erf(h1 + b1c.astype(jnp.float32))
            # fc2 chunk: (tm, tc) @ (tc, Do_pad) -> f32 partial.
            return jnp.dot(h1.astype(w2c.dtype), w2c,
                           preferred_element_type=jnp.float32)

        if n_chunks == 1:
            acc = fc_block(w1_ref[...], b1_ref[...], w2_ref[...])
        else:
            def body(c, acc):
                start = pl.multiple_of(c * tc, 128)
                return acc + fc_block(w1_ref[:, pl.ds(start, tc)],
                                      b1_ref[:, pl.ds(start, tc)],
                                      w2_ref[pl.ds(start, tc), :])
            acc = jax.lax.fori_loop(0, n_chunks, body,
                                    jnp.zeros(o_ref.shape, jnp.float32))

        o_ref[...] = (acc + b2_ref[...].astype(jnp.float32)).astype(o_ref.dtype)

    return kernel


# ---------------------------------------------------------------------------
# Fallback kernel (weights too big for VMEM): grid = (row_tiles, Dh_tiles),
# Dh is the reduction ("arbitrary") axis with a f32 VMEM accumulator.
# ---------------------------------------------------------------------------
def _tiled_kernel(x_ref, g_ref, be_ref, w1_ref, b1_ref, w2_ref, b2_ref,
                  o_ref, h_ref, acc_ref):
    k = pl.program_id(1)
    nk = pl.num_programs(1)

    @pl.when(k == 0)
    def _():
        x = x_ref[...].astype(jnp.float32)
        mean = jnp.mean(x, axis=-1, keepdims=True)
        var = jnp.mean((x - mean) ** 2, axis=-1, keepdims=True)
        h = (x - mean) * jax.lax.rsqrt(var + 1e-5)
        h = h * g_ref[...].astype(jnp.float32) + be_ref[...].astype(jnp.float32)
        h_ref[...] = h.astype(h_ref.dtype)
        acc_ref[...] = jnp.zeros_like(acc_ref)

    h1 = jnp.dot(h_ref[...], w1_ref[...], preferred_element_type=jnp.float32)
    h1 = _gelu_erf(h1 + b1_ref[...].astype(jnp.float32))
    acc_ref[...] += jnp.dot(h1.astype(w2_ref.dtype), w2_ref[...],
                            preferred_element_type=jnp.float32)

    @pl.when(k == nk - 1)
    def _():
        o_ref[...] = (acc_ref[...] + b2_ref[...].astype(jnp.float32)
                      ).astype(o_ref.dtype)


# ---------------------------------------------------------------------------
# Host-side wrapper.
# ---------------------------------------------------------------------------
def prepare_head_params(gamma, beta, w1, b1, w2, b2,
                        *, weight_dtype=jnp.bfloat16):
    """One-time weight prep (cast + output-dim pad), hoisted out of the call."""
    D, Dh = w1.shape
    Do = w2.shape[1]
    Do_pad = _round_up(Do, 128)          # lane-dense output stores
    w2p = jnp.pad(w2, ((0, 0), (0, Do_pad - Do))) if Do_pad != Do else w2
    b2p = jnp.pad(b2, (0, Do_pad - Do)) if Do_pad != Do else b2
    return dict(
        gamma=gamma.reshape(1, D).astype(jnp.float32),
        beta=beta.reshape(1, D).astype(jnp.float32),
        w1=w1.astype(weight_dtype),                      # (D, 4D), x@W layout
        b1=b1.reshape(1, Dh).astype(jnp.float32),
        w2=w2p.astype(weight_dtype),                     # (4D, Do_pad)
        b2=b2p.reshape(1, Do_pad).astype(jnp.float32),
        dim_out=Do,
    )


def whisper_head_pallas(hidden, params, *, tm=256, tc=512,
                        vmem_budget_bytes=48 * 1024 * 1024):
    """hidden: [B, S, dim_in] (native dtype) -> [B, S, dim_out].

    Tuning notes:
      v5e : tm=128-256 is plenty (compute-bound); resident weights keep DMA
            hidden under MXU time.  Keep GELU in f32 (no bf16 VPU/EUP).
      v6e : tm=256-512, weights resident (26 MB at D=1280 easily fits 128 MiB);
            raise vmem_budget_bytes to ~80-96 MiB if you want bigger row tiles.
      v7x : 64 MiB VMEM per TensorCore and each TC holds its own weight copy
            under the parallel row axis; keep tm<=256-384 and the default
            48 MiB budget.
    """
    gamma, beta = params["gamma"], params["beta"]
    w1, b1, w2, b2 = params["w1"], params["b1"], params["w2"], params["b2"]
    Do = params["dim_out"]

    B, S, D = hidden.shape
    Dh = w1.shape[1]
    Do_pad = w2.shape[1]
    M = B * S

    x = hidden.reshape(M, D)           # native dtype; f32 cast happens in-kernel
    x_isz = x.dtype.itemsize
    o_isz = jnp.dtype(hidden.dtype).itemsize

    weight_bytes = (w1.size * w1.dtype.itemsize + w2.size * w2.dtype.itemsize
                    + (b1.size + b2.size + gamma.size + beta.size) * 4)

    tm = max(8, _round_up(min(tm, _round_up(M, 8)), 8))
    tc_res = _largest_tile(Dh, tc)
    n_chunks = Dh // tc_res

    def per_tile_bytes(tm_):
        return (2 * tm_ * D * x_isz            # x tile, double-buffered
                + 2 * tm_ * Do_pad * o_isz     # out tile, double-buffered
                + tm_ * Do_pad * 4             # f32 accumulation carry
                + tm_ * D * 2                  # bf16 LN output
                + 2 * tm_ * tc_res * 4)        # h1 chunk + slack

    tm_res = tm
    while tm_res > 8 and weight_bytes + per_tile_bytes(tm_res) > vmem_budget_bytes:
        tm_res = max(8, _round_up(tm_res // 2, 8))
    resident = weight_bytes + per_tile_bytes(tm_res) <= vmem_budget_bytes

    if resident:
        # ----- resident-weights path: weights DMA'd exactly once -------------
        tm_r = tm_res
        M_pad = _round_up(M, tm_r)
        xk = jnp.pad(x, ((0, M_pad - M), (0, 0))) if M_pad != M else x

        cost = pl.CostEstimate(
            flops=2 * M_pad * (D * Dh + Dh * Do_pad),
            transcendentals=M_pad * Dh,
            bytes_accessed=int(M_pad * D * x_isz + M_pad * Do_pad * o_isz
                               + weight_bytes),
        )
        out = pl.pallas_call(
            _make_resident_kernel(tc_res, n_chunks),
            out_shape=jax.ShapeDtypeStruct((M_pad, Do_pad), hidden.dtype),
            grid=(M_pad // tm_r,),
            in_specs=[
                pl.BlockSpec((tm_r, D), lambda i: (i, 0)),       # x row tile
                _const_spec((1, D), lambda i: (0, 0)),           # gamma
                _const_spec((1, D), lambda i: (0, 0)),           # beta
                _const_spec((D, Dh), lambda i: (0, 0)),          # W1 resident
                _const_spec((1, Dh), lambda i: (0, 0)),          # b1
                _const_spec((Dh, Do_pad), lambda i: (0, 0)),     # W2 resident
                _const_spec((1, Do_pad), lambda i: (0, 0)),      # b2
            ],
            out_specs=pl.BlockSpec((tm_r, Do_pad), lambda i: (i, 0)),
            compiler_params=pltpu.CompilerParams(
                dimension_semantics=("parallel",),
                vmem_limit_bytes=int(vmem_budget_bytes),
            ),
            cost_estimate=cost,
        )(xk, gamma, beta, w1, b1, w2, b2)
    else:
        # ----- fallback: weights don't fit VMEM; tile Dh on the grid ---------
        tm_f = max(8, _round_up(min(max(tm, 512), _round_up(M, 8)), 8))
        M_pad = _round_up(M, tm_f)
        xk = jnp.pad(x, ((0, M_pad - M), (0, 0))) if M_pad != M else x
        tn = _largest_tile(Dh, max(tc, 512))
        nk = Dh // tn
        n_row_tiles = M_pad // tm_f

        if nk == 1:
            w1_spec = _const_spec((D, tn), lambda i, k: (0, 0))
            b1_spec = _const_spec((1, tn), lambda i, k: (0, 0))
            w2_spec = _const_spec((tn, Do_pad), lambda i, k: (0, 0))
        else:
            w1_spec = pl.BlockSpec((D, tn), lambda i, k: (0, k))
            b1_spec = pl.BlockSpec((1, tn), lambda i, k: (0, k))
            w2_spec = pl.BlockSpec((tn, Do_pad), lambda i, k: (k, 0))

        cost = pl.CostEstimate(
            flops=2 * M_pad * (D * Dh + Dh * Do_pad),
            transcendentals=M_pad * Dh,
            bytes_accessed=int(M_pad * D * x_isz + M_pad * Do_pad * o_isz
                               + n_row_tiles * weight_bytes),  # real re-streaming
        )
        out = pl.pallas_call(
            _tiled_kernel,
            out_shape=jax.ShapeDtypeStruct((M_pad, Do_pad), hidden.dtype),
            grid=(n_row_tiles, nk),
            in_specs=[
                pl.BlockSpec((tm_f, D), lambda i, k: (i, 0)),
                _const_spec((1, D), lambda i, k: (0, 0)),
                _const_spec((1, D), lambda i, k: (0, 0)),
                w1_spec, b1_spec, w2_spec,
                _const_spec((1, Do_pad), lambda i, k: (0, 0)),
            ],
            out_specs=pl.BlockSpec((tm_f, Do_pad), lambda i, k: (i, 0)),
            scratch_shapes=[
                pltpu.VMEM((tm_f, D), w1.dtype),       # LN output (reused over k)
                pltpu.VMEM((tm_f, Do_pad), jnp.float32),  # fc2 accumulator
            ],
            compiler_params=pltpu.CompilerParams(
                dimension_semantics=("parallel", "arbitrary"),
                vmem_limit_bytes=int(vmem_budget_bytes),
            ),
            cost_estimate=cost,
        )(xk, gamma, beta, w1, b1, w2, b2)

    return out[:M, :Do].reshape(B, S, Do)


# ---------------------------------------------------------------------------
# Stub encoder (plain-JAX glue).
# TODO(synk): the real `encoder` is an external Whisper encoder submodule
# passed into __init__; here it is a deterministic per-frame linear projection
# standing in for `encoder(speech)[0]`.
# ---------------------------------------------------------------------------
def stub_encoder(speech, w_enc, b_enc):
    # speech: [B, n_mels, T]  ->  hidden: [B, T, dim_in]
    feats = jnp.transpose(speech, (0, 2, 1))          # [B, T, n_mels]
    return feats @ w_enc + b_enc


def reference_head(hidden, gamma, beta, w1, b1, w2, b2,
                   weight_dtype=jnp.bfloat16):
    """Pure-JAX reference mirroring the kernel's bf16-GEMM / f32-accumulate path."""
    x = hidden.astype(jnp.float32)
    mean = jnp.mean(x, axis=-1, keepdims=True)
    var = jnp.mean((x - mean) ** 2, axis=-1, keepdims=True)
    h = (x - mean) * jax.lax.rsqrt(var + 1e-5) * gamma + beta
    h1 = jnp.dot(h.astype(weight_dtype), w1.astype(weight_dtype),
                 preferred_element_type=jnp.float32) + b1
    h1 = _gelu_erf(h1)
    return jnp.dot(h1.astype(weight_dtype), w2.astype(weight_dtype),
                   preferred_element_type=jnp.float32) + b2


if __name__ == "__main__":
    # Small shapes consistent with the module's forward:
    #   speech [B, n_mels, T], encoder -> hidden [B, T, dim_in]
    B, n_mels, T = 2, 4, 8
    dim_in, dim_out = 32, 32          # same_shape = True
    dim_hidden = dim_in * 4           # 128

    key = jax.random.PRNGKey(0)
    ks = jax.random.split(key, 8)

    speech = jax.random.normal(ks[0], (B, n_mels, T), dtype=jnp.float32)

    # Stub-encoder params (glue, deterministic)
    w_enc = jax.random.normal(ks[1], (n_mels, dim_in), dtype=jnp.float32) * 0.1
    b_enc = jax.random.normal(ks[2], (dim_in,), dtype=jnp.float32) * 0.01

    # Head params. PyTorch nn.Linear stores weight as (out, in); initialize in
    # that convention and transpose once (glue) into x@W layout.
    w1_pt = jax.random.normal(ks[3], (dim_hidden, dim_in), dtype=jnp.float32) * 0.05
    b1 = jax.random.normal(ks[4], (dim_hidden,), dtype=jnp.float32) * 0.01
    w2_pt = jax.random.normal(ks[5], (dim_out, dim_hidden), dtype=jnp.float32) * 0.05
    b2 = jax.random.normal(ks[6], (dim_out,), dtype=jnp.float32) * 0.01
    gamma = jnp.ones((dim_in,), dtype=jnp.float32)
    beta = jnp.zeros((dim_in,), dtype=jnp.float32)

    w1 = w1_pt.T   # (dim_in, 4*dim_in)
    w2 = w2_pt.T   # (4*dim_in, dim_out)

    # forward: hidden = encoder(speech)[0]; head(hidden)
    hidden = stub_encoder(speech, w_enc, b_enc)

    # One-time weight preprocessing (hoisted out of the per-call path).
    params = prepare_head_params(gamma, beta, w1, b1, w2, b2)

    out = whisper_head_pallas(hidden, params)
    out = jax.block_until_ready(out)

    ref = reference_head(hidden, gamma, beta, w1, b1, w2, b2)
    assert out.shape == (B, T, dim_out)
    assert jnp.allclose(out, ref, atol=5e-3, rtol=5e-3), (
        float(jnp.max(jnp.abs(out - ref))))

    print("KERNEL_OK")
</pallas_src>

<mosaic_0001>
module attributes {stable_mosaic.version = 11 : i64} {
  func.func @kernel(%arg0: i32, %arg1: memref<16x32xf32, #tpu.memory_space<vmem>>, %arg2: memref<1x32xf32, #tpu.memory_space<vmem>>, %arg3: memref<1x32xf32, #tpu.memory_space<vmem>>, %arg4: memref<32x128xbf16, #tpu.memory_space<vmem>>, %arg5: memref<1x128xf32, #tpu.memory_space<vmem>>, %arg6: memref<128x128xbf16, #tpu.memory_space<vmem>>, %arg7: memref<1x128xf32, #tpu.memory_space<vmem>>, %arg8: memref<16x128xf32, #tpu.memory_space<vmem>>) attributes {dimension_semantics = [#tpu.dimension_semantics<parallel>], iteration_bounds = array<i64: 1>, scalar_prefetch = 0 : i64, scratch_operands = 0 : i64, tpu.core_type = #tpu.core_type<tc>, window_params = [{transform_indices = @transform_0, window_bounds = array<i64: 16, 32>}, {pipeline_mode = #tpu.pipeline_mode<synchronous>, transform_indices = @transform_1, window_bounds = array<i64: 1, 32>}, {pipeline_mode = #tpu.pipeline_mode<synchronous>, transform_indices = @transform_2, window_bounds = array<i64: 1, 32>}, {pipeline_mode = #tpu.pipeline_mode<synchronous>, transform_indices = @transform_3, window_bounds = array<i64: 32, 128>}, {pipeline_mode = #tpu.pipeline_mode<synchronous>, transform_indices = @transform_4, window_bounds = array<i64: 1, 128>}, {pipeline_mode = #tpu.pipeline_mode<synchronous>, transform_indices = @transform_5, window_bounds = array<i64: 128, 128>}, {pipeline_mode = #tpu.pipeline_mode<synchronous>, transform_indices = @transform_6, window_bounds = array<i64: 1, 128>}, {transform_indices = @transform_7, window_bounds = array<i64: 16, 128>}]} {
    %c0 = arith.constant 0 : index
    %c0_0 = arith.constant 0 : index
    %0 = vector.load %arg1[%c0, %c0_0] : memref<16x32xf32, #tpu.memory_space<vmem>>, vector<16x32xf32>
    %cst = arith.constant dense<0.000000e+00> : vector<16xf32>
    %1 = vector.multi_reduction <add>, %0, %cst [1] : vector<16x32xf32> to vector<16xf32>
    %2 = vector.shape_cast %1 : vector<16xf32> to vector<16x1xf32>
    %cst_1 = arith.constant 3.200000e+01 : f32
    %3 = vector.broadcast %cst_1 : f32 to vector<16x1xf32>
    %4 = arith.divf %2, %3 : vector<16x1xf32>
    %5 = vector.broadcast %4 : vector<16x1xf32> to vector<16x32xf32>
    %6 = arith.subf %0, %5 : vector<16x32xf32>
    %7 = arith.mulf %6, %6 : vector<16x32xf32>
    %cst_2 = arith.constant dense<0.000000e+00> : vector<16xf32>
    %8 = vector.multi_reduction <add>, %7, %cst_2 [1] : vector<16x32xf32> to vector<16xf32>
    %9 = vector.shape_cast %8 : vector<16xf32> to vector<16x1xf32>
    %cst_3 = arith.constant 3.200000e+01 : f32
    %10 = vector.broadcast %cst_3 : f32 to vector<16x1xf32>
    %11 = arith.divf %9, %10 : vector<16x1xf32>
    %12 = vector.broadcast %4 : vector<16x1xf32> to vector<16x32xf32>
    %13 = arith.subf %0, %12 : vector<16x32xf32>
    %cst_4 = arith.constant 9.99999974E-6 : f32
    %14 = vector.broadcast %cst_4 : f32 to vector<16x1xf32>
    %15 = arith.addf %11, %14 : vector<16x1xf32>
    %16 = math.rsqrt %15 : vector<16x1xf32>
    %17 = vector.broadcast %16 : vector<16x1xf32> to vector<16x32xf32>
    %18 = arith.mulf %13, %17 : vector<16x32xf32>
    %c0_5 = arith.constant 0 : index
    %c0_6 = arith.constant 0 : index
    %19 = vector.load %arg2[%c0_5, %c0_6] : memref<1x32xf32, #tpu.memory_space<vmem>>, vector<1x32xf32>
    %20 = vector.broadcast %19 : vector<1x32xf32> to vector<16x32xf32>
    %21 = arith.mulf %18, %20 : vector<16x32xf32>
    %c0_7 = arith.constant 0 : index
    %c0_8 = arith.constant 0 : index
    %22 = vector.load %arg3[%c0_7, %c0_8] : memref<1x32xf32, #tpu.memory_space<vmem>>, vector<1x32xf32>
    %23 = vector.broadcast %22 : vector<1x32xf32> to vector<16x32xf32>
    %24 = arith.addf %21, %23 : vector<16x32xf32>
    %25 = arith.truncf %24 : vector<16x32xf32> to vector<16x32xbf16>
    %c0_9 = arith.constant 0 : index
    %c0_10 = arith.constant 0 : index
    %26 = vector.load %arg4[%c0_9, %c0_10] : memref<32x128xbf16, #tpu.memory_space<vmem>>, vector<32x128xbf16>
    %c0_11 = arith.constant 0 : index
    %c0_12 = arith.constant 0 : index
    %27 = vector.load %arg5[%c0_11, %c0_12] : memref<1x128xf32, #tpu.memory_space<vmem>>, vector<1x128xf32>
    %c0_13 = arith.constant 0 : index
    %c0_14 = arith.constant 0 : index
    %28 = vector.load %arg6[%c0_13, %c0_14] : memref<128x128xbf16, #tpu.memory_space<vmem>>, vector<128x128xbf16>
    %cst_15 = arith.constant dense<0.000000e+00> : vector<16x128xf32>
    %29 = tpu.matmul %25, %26, %cst_15 {dimension_numbers = #tpu.dot_dimension_numbers<[1], [0], [0], [1], [0, 0, 1, 1], [], []>} : vector<16x32xbf16>, vector<32x128xbf16>, vector<16x128xf32> -> vector<16x128xf32>
    %30 = vector.broadcast %27 : vector<1x128xf32> to vector<16x128xf32>
    %31 = arith.addf %29, %30 : vector<16x128xf32>
    %cst_16 = arith.constant 5.000000e-01 : f32
    %32 = vector.broadcast %cst_16 : f32 to vector<16x128xf32>
    %33 = arith.mulf %32, %31 : vector<16x128xf32>
    %cst_17 = arith.constant 0.707106769 : f32
    %34 = vector.broadcast %cst_17 : f32 to vector<16x128xf32>
    %35 = arith.mulf %31, %34 : vector<16x128xf32>
    %36 = math.erf %35 : vector<16x128xf32>
    %cst_18 = arith.constant 1.000000e+00 : f32
    %37 = vector.broadcast %cst_18 : f32 to vector<16x128xf32>
    %38 = arith.addf %37, %36 : vector<16x128xf32>
    %39 = arith.mulf %33, %38 : vector<16x128xf32>
    %40 = arith.truncf %39 : vector<16x128xf32> to vector<16x128xbf16>
    %cst_19 = arith.constant dense<0.000000e+00> : vector<16x128xf32>
    %41 = tpu.matmul %40, %28, %cst_19 {dimension_numbers = #tpu.dot_dimension_numbers<[1], [0], [0], [1], [0, 0, 1, 1], [], []>} : vector<16x128xbf16>, vector<128x128xbf16>, vector<16x128xf32> -> vector<16x128xf32>
    %c0_20 = arith.constant 0 : index
    %c0_21 = arith.constant 0 : index
    %42 = vector.load %arg7[%c0_20, %c0_21] : memref<1x128xf32, #tpu.memory_space<vmem>>, vector<1x128xf32>
    %43 = vector.broadcast %42 : vector<1x128xf32> to vector<16x128xf32>
    %44 = arith.addf %41, %43 : vector<16x128xf32>
    %c0_22 = arith.constant 0 : index
    %c0_23 = arith.constant 0 : index
    %45 = vector.load %arg8[%c0_22, %c0_23] : memref<16x128xf32, #tpu.memory_space<vmem>>, vector<16x128xf32>
    tpu.vector_store %arg8[%c0_22, %c0_23], %44 {strides = array<i32>} : memref<16x128xf32, #tpu.memory_space<vmem>>, vector<16x128xf32>,
    return
  }
  func.func @transform_0(%arg0: i32) -> (i32, i32) {
    %c0_i32 = arith.constant 0 : i32
    %c0_i32_0 = arith.constant 0 : i32
    return %arg0, %c0_i32 : i32, i32
  }
  func.func @transform_1(%arg0: i32) -> (i32, i32) {
    %c0_i32 = arith.constant 0 : i32
    %c0_i32_0 = arith.constant 0 : i32
    %c0_i32_1 = arith.constant 0 : i32
    return %c0_i32, %c0_i32_0 : i32, i32
  }
  func.func @transform_2(%arg0: i32) -> (i32, i32) {
    %c0_i32 = arith.constant 0 : i32
    %c0_i32_0 = arith.constant 0 : i32
    %c0_i32_1 = arith.constant 0 : i32
    return %c0_i32, %c0_i32_0 : i32, i32
  }
  func.func @transform_3(%arg0: i32) -> (i32, i32) {
    %c0_i32 = arith.constant 0 : i32
    %c0_i32_0 = arith.constant 0 : i32
    %c0_i32_1 = arith.constant 0 : i32
    return %c0_i32, %c0_i32_0 : i32, i32
  }
  func.func @transform_4(%arg0: i32) -> (i32, i32) {
    %c0_i32 = arith.constant 0 : i32
    %c0_i32_0 = arith.constant 0 : i32
    %c0_i32_1 = arith.constant 0 : i32
    return %c0_i32, %c0_i32_0 : i32, i32
  }
  func.func @transform_5(%arg0: i32) -> (i32, i32) {
    %c0_i32 = arith.constant 0 : i32
    %c0_i32_0 = arith.constant 0 : i32
    %c0_i32_1 = arith.constant 0 : i32
    return %c0_i32, %c0_i32_0 : i32, i32
  }
  func.func @transform_6(%arg0: i32) -> (i32, i32) {
    %c0_i32 = arith.constant 0 : i32
    %c0_i32_0 = arith.constant 0 : i32
    %c0_i32_1 = arith.constant 0 : i32
    return %c0_i32, %c0_i32_0 : i32, i32
  }
  func.func @transform_7(%arg0: i32) -> (i32, i32) {
    %c0_i32 = arith.constant 0 : i32
    %c0_i32_0 = arith.constant 0 : i32
    return %arg0, %c0_i32 : i32, i32
  }
}

</mosaic_0001>

<bundles_post_ra>
// kernel: tpu_custom_call.1
= control target key start
LH: loop header
LB: loop body
LE: loop exit
PB: predicated region body
PF: predicated region fallthrough
CT: control target
= control target key end

     0   :  { %12 = vsyncpa [#allocation3], 0  ;;  %s632_s0 = inlined_call_operand.hbm [shape: f32[16,32], index: 0, kind: input, shape index: {}]   ;;  %s633_s1 = inlined_call_operand.vmem [shape: f32[1,32], index: 1, kind: input, shape index: {}]   ;;  %s634_s2 = inlined_call_operand.vmem [shape: f32[1,32], index: 2, kind: input, shape index: {}]   ;;  %s635_s3 = inlined_call_operand.hbm [shape: bf16[32,128], index: 3, kind: input, shape index: {}]   ;;  %s636_s4 = inlined_call_operand.vmem [shape: f32[1,128], index: 4, kind: input, shape index: {}]   ;;  %s637_s5 = inlined_call_operand.hbm [shape: bf16[128,128], index: 5, kind: input, shape index: {}]   ;;  %s638_s6 = inlined_call_operand.vmem [shape: f32[1,128], index: 6, kind: input, shape index: {}]   ;;  %s639_s7 = inlined_call_operand.hbm [shape: f32[16,128], index: 7, kind: output, shape index: {}]  }
   0x1   :  { %13 = vsyncpa [#allocation6], 0 }
   0x2   :  { %14 = vsyncpa [#allocation4], 0  ;;  %s505_s24 = smov [#allocation5]   ;;  %s411_s28 = scalar_lea.hbm %s635_s3, 256 }
   0x3   :  { %s36_s25 = sshll.u32 %s505_s24, 4  ;;  %p412_p0 = scmp.ne.s32.totalorder %s635_s3, %s411_s28  ;;  %s37_s25 = int_to_ptr.vmem [resolvable:$true] %s36_s25 }
   0x4   :  { %p415_p1 = scmp.lt.u32.totalorder %s411_s28, %s635_s3 }
   0x6   :  { %p417_p2 = pnand %p415_p1, %p412_p0 }
   0x8   :  { %420 = shalt.err (!%p417_p2)
}
   0x9   :  { %s421_s10 = scalar_lea.vmem %s37_s25, 256  ;;  %p426_p4 = scmp.lt.s32.totalorder %s37_s25, %s37_s25 }
   0xa   :  { %p422_p3 = scmp.ne.s32.totalorder %s37_s25, %s421_s10  ;;  %p427_p5 = scmp.lt.s32.totalorder %s421_s10, %s421_s10 }
   0xc   :  { %p428_p6 = por %p427_p5, %p426_p4 }
   0xe   :  { %p429_p7 = pnand %p428_p6, %p422_p3 }
  0x10   :  { %432 = shalt.err (!%p429_p7)
}
  0x11   :  { %s506_s11 = smov 64   ;;  %s507_s12 = smov 4  }
  0x12   :  { %42 = dma.hbm_to_vmem [thread:$0]  %s635_s3, 256, %s37_s25, [#allocation6], %s506_s11, %s506_s11, %s507_s12  }
  0x13   :  { %s508_s15 = smov [#allocation2]   ;;  %s433_s19 = scalar_lea.hbm %s632_s0, 256 }
  0x14   :  { %s20_s16 = sshll.u32 %s508_s15, 4  ;;  %p434_p8 = scmp.ne.s32.totalorder %s632_s0, %s433_s19  ;;  %s21_s16 = int_to_ptr.vmem [resolvable:$true] %s20_s16 }
  0x15   :  { %p437_p9 = scmp.lt.u32.totalorder %s433_s19, %s632_s0 }
  0x17   :  { %p439_p10 = pnand %p437_p9, %p434_p8 }
  0x19   :  { %442 = shalt.err (!%p439_p10)
}
  0x1a   :  { %s443_s24 = scalar_lea.vmem %s21_s16, 256  ;;  %p448_p12 = scmp.lt.s32.totalorder %s21_s16, %s21_s16 }
  0x1b   :  { %p444_p11 = scmp.ne.s32.totalorder %s21_s16, %s443_s24  ;;  %p449_p13 = scmp.lt.s32.totalorder %s443_s24, %s443_s24 }
  0x1d   :  { %p450_p0 = por %p449_p13, %p448_p12 }
  0x1f   :  { %p451_p1 = pnand %p450_p0, %p444_p11 }
  0x21   :  { %454 = shalt.err (!%p451_p1)
}
  0x22   :  { %s509_s3 = smov 128   ;;  %s510_s25 = smov 8  }
  0x23   :  { %26 = dma.hbm_to_vmem [thread:$0]  %s632_s0, 256, %s21_s16, [#allocation3], %s509_s3, %s509_s3, %s510_s25  }
  0x24   :  { %s511_s28 = smov [#allocation7]   ;;  %s455_s9 = scalar_lea.hbm %s637_s5, 1024 }
  0x25   :  { %s50_s29 = sshll.u32 %s511_s28, 4  ;;  %p456_p2 = scmp.ne.s32.totalorder %s637_s5, %s455_s9  ;;  %s51_s29 = int_to_ptr.vmem [resolvable:$true] %s50_s29 }
  0x26   :  { %p459_p3 = scmp.lt.u32.totalorder %s455_s9, %s637_s5 }
  0x28   :  { %p461_p4 = pnand %p459_p3, %p456_p2 }
  0x2a   :  { %464 = shalt.err (!%p461_p4)
}
  0x2b   :  { %s465_s17 = scalar_lea.vmem %s51_s29, 1024  ;;  %p470_p6 = scmp.lt.s32.totalorder %s51_s29, %s51_s29 }
  0x2c   :  { %p466_p5 = scmp.ne.s32.totalorder %s51_s29, %s465_s17  ;;  %p471_p7 = scmp.lt.s32.totalorder %s465_s17, %s465_s17 }
  0x2e   :  { %p472_p8 = por %p471_p7, %p470_p6 }
  0x30   :  { %p473_p9 = pnand %p472_p8, %p466_p5 }
  0x32   :  { %476 = shalt.err (!%p473_p9)
}
  0x33   :  { %56 = dma.hbm_to_vmem [thread:$0]  %s637_s5, 1024, %s51_s29, [#allocation6], %s506_s11, %s506_s11, %s507_s12  }
  0x34   :  { %499 = dma.done.wait [#allocation3], 256  }
  0x35   :  { %500 = vsyncadd [#allocation3], 4294967040 }
  0x36   :  { %501 = dma.done.wait [#allocation6], 1280  }
  0x37   :  { %502 = vsyncadd [#allocation6], 4294966016  ;;  %vm71_vm0 = vcmask 261120   ;;  %v69_v0 = vld [vmem:[#allocation2] sm:$0xff]  ;;  %v70_v1 = vld [vmem:[#allocation2 + $0x8] sm:$0xff]  ;;  %v512_v15 = vmov 0.0  }
  0x38   :  { %v72_v2 = vsel %vm71_vm0, %v69_v0, 0.0  ;;  %v75_v3 = vsel %vm71_vm0, %v70_v1, 0.0  ;;  %v393_v14 = vld [vmem:[#allocation5] sm:$0xff]   ;;  %355 = vmatprep.subr.bf16.mxu0 %v512_v15  ;;  %363 = vmatprep.subr.bf16.mxu1 %v512_v15  ;;  %v394_v16 = vld [vmem:[#allocation5 + $0x8] sm:$0xff]   ;;  %vm513_vm1 = vmmov 0   ;;  %v395_v17 = vld [vmem:[#allocation7] sm:$0xff]  }
  0x39   :  { %73 = vadd.xlane.f32.xlu0 %v72_v2  ;;  %356 = vmatpush3.bf16.msra.mxu0 %v393_v14  ;;  %v396_v18 = vld [vmem:[#allocation7 + $0x8] sm:$0xff]   ;;  %v328_v27 = vld [vmem:[%s633_s1] ss:$0 sm:$0xff]  ;;  %v397_v36 = vld [vmem:[#allocation7 + $0x10] sm:$0xff]   ;;  %s514_s20 = smov [#allocation8]  }
  0x3a   :  { %359 = vmatprep.mubr.msk.bf16.mxu0 %vm513_vm1, %v512_v15  ;;  %357 = vmatprep.subr.bf16.mxu0 %v512_v15  ;;  %v329_v31 = vld [vmem:[%s634_s2] ss:$0 sm:$0xff]  ;;  %v398_v37 = vld [vmem:[#allocation7 + $0x18] sm:$0xff]   ;;  %v400_v39 = vld [vmem:[#allocation7 + $0x28] sm:$0xff]   ;;  %s315_s21 = sshll.u32 %s514_s20, 4  ;;  %s316_s21 = int_to_ptr.vmem [resolvable:$true] %s315_s21 }
  0x3b   :  { %379 = vmatprep.mubr.msk.bf16.mxu1 %vm513_vm1, %v512_v15  ;;  %364 = vmatpush3.bf16.msra.mxu1 %v395_v17  ;;  %v399_v38 = vld [vmem:[#allocation7 + $0x20] sm:$0xff]   ;;  %v401_v40 = vld [vmem:[#allocation7 + $0x30] sm:$0xff]   ;;  %v402_v41 = vld [vmem:[#allocation7 + $0x38] sm:$0xff]   ;;  %s477_s22 = scalar_lea.vmem %s316_s21, 256  ;;  %p482_p11 = scmp.lt.s32.totalorder %s316_s21, %s316_s21 }
  0x3c   :  { %365 = vmatprep.subr.bf16.mxu1 %v512_v15  ;;  %v330_v42 = vld [vmem:[%s636_s4] ss:$0 sm:$0xff]  ;;  %p478_p10 = scmp.ne.s32.totalorder %s316_s21, %s477_s22  ;;  %p483_p12 = scmp.lt.s32.totalorder %s477_s22, %s477_s22 }
  0x3d   :  { %76 = vadd.xlane.f32.xlu0 %v75_v3  ;;  %358 = vmatpush3.bf16.msra.mxu0 %v394_v16  ;;  %v334_v60 = vld [vmem:[%s638_s6] ss:$0 sm:$0xff] }
  0x3e   :  { %p484_p13 = por %p483_p12, %p482_p11 }
  0x3f   :  { %366 = vmatpush3.bf16.msra.mxu1 %v396_v18 }
  0x40   :  { %367 = vmatprep.subr.bf16.mxu1 %v512_v15  ;;  %p485_p0 = pnand %p484_p13, %p478_p10 }
  0x43   :  { %368 = vmatpush3.bf16.msra.mxu1 %v397_v36 }
  0x44   :  { %369 = vmatprep.subr.bf16.mxu1 %v512_v15 }
  0x47   :  { %370 = vmatpush3.bf16.msra.mxu1 %v398_v37 }
  0x48   :  { %371 = vmatprep.subr.bf16.mxu1 %v512_v15 }
  0x4b   :  { %372 = vmatpush3.bf16.msra.mxu1 %v399_v38 }
  0x4c   :  { %373 = vmatprep.subr.bf16.mxu1 %v512_v15 }
  0x4f   :  { %374 = vmatpush3.bf16.msra.mxu1 %v400_v39 }
  0x50   :  { %375 = vmatprep.subr.bf16.mxu1 %v512_v15 }
  0x53   :  { %376 = vmatpush3.bf16.msra.mxu1 %v401_v40 }
  0x54   :  { %377 = vmatprep.subr.bf16.mxu1 %v512_v15 }
  0x57   :  { %378 = vmatpush3.bf16.msra.mxu1 %v402_v41 }
  0xc6   :  { %v74_v4 = vpop.xlane.xlu0 %73 }
  0xc7   :  { %v79_v5 = vmul.f32 0.03125, %v74_v4 }
  0xc9   :  { %v81_v6 = vsub.f32 %v69_v0, %v79_v5 }
  0xca   :  { %v77_v7 = vpop.xlane.xlu0 %76 }
  0xcb   :  { %v80_v8 = vmul.f32 0.03125, %v77_v7  ;;  %v83_v9 = vmul.f32 %v81_v6, %v81_v6 }
  0xcd   :  { %v82_v10 = vsub.f32 %v70_v1, %v80_v8  ;;  %v85_v11 = vsel %vm71_vm0, %v83_v9, 0.0 }
  0xce   :  { %86 = vadd.xlane.f32.xlu1 %v85_v11 }
  0xcf   :  { %v84_v12 = vmul.f32 %v82_v10, %v82_v10 }
  0xd1   :  { %v88_v13 = vsel %vm71_vm0, %v84_v12, 0.0 }
  0xd2   :  { %89 = vadd.xlane.f32.xlu1 %v88_v13 }
 0x15b   :  { %v87_v19 = vpop.xlane.xlu1 %86 }
 0x15c   :  { %v91_v20 = vmul.f32 0.03125, %v87_v19 }
 0x15e   :  { %v93_v21 = vadd.f32 1e-05, %v91_v20 }
 0x15f   :  { %v90_v22 = vpop.xlane.xlu1 %89 }
 0x160   :  { %403 = vrsqrt.f32 %v93_v21  ;;  %v92_v23 = vmul.f32 0.03125, %v90_v22 }
 0x162   :  { %v94_v24 = vadd.f32 1e-05, %v92_v23 }
 0x164   :  { %405 = vrsqrt.f32 %v94_v24 }
 0x16a   :  { %v404_v25 = vpop.eup %403 }
 0x16b   :  { %v97_v26 = vmul.f32 %v404_v25, %v81_v6 }
 0x16d   :  { %v106_v30 = vmul.f32 %v328_v27, %v97_v26 }
 0x16e   :  { %v406_v28 = vpop.eup %405 }
 0x16f   :  { %v98_v29 = vmul.f32 %v406_v28, %v82_v10  ;;  %v115_v33 = vadd.f32 %v329_v31, %v106_v30 }
 0x171   :  { %v107_v32 = vmul.f32 %v328_v27, %v98_v29 }
 0x173   :  { %v116_v34 = vadd.f32 %v329_v31, %v107_v32 }
 0x175   :  { %v117_v35 = vpack.c.bf16 %v116_v34, %v115_v33 }
 0x177   :  { %360 = vmatmul.mubr.msk.bf16.vlgmr.msra.gmra.mrb[0].mxu0 %vm71_vm0, %v117_v35 }
 0x24a   :  { %v194_v43 = vpop.f32.mrb[0].mxu0 }
 0x24b   :  { %v195_v44 = vadd.f32 %v330_v42, %v194_v43  ;;  %v361_v45 = vpop.f32.mrb[1].mxu0 }
 0x24c   :  { %v197_v46 = vpop.f32.mrb[2].mxu0 }
 0x24d   :  { %v203_v47 = vmul.f32 0.70710677, %v195_v44  ;;  %v198_v48 = vadd.f32 %v330_v42, %v197_v46  ;;  %v362_v49 = vpop.f32.mrb[3].mxu0  ;;  %v201_v54 = vmul.f32 0.5, %v195_v44 }
 0x24f   :  { %407 = verf.f32 %v203_v47  ;;  %v204_v50 = vmul.f32 0.70710677, %v198_v48  ;;  %v202_v55 = vmul.f32 0.5, %v198_v48 }
 0x251   :  { %409 = verf.f32 %v204_v50 }
 0x259   :  { %v408_v51 = vpop.eup %407 }
 0x25a   :  { %v207_v52 = vadd.f32 1.0, %v408_v51 }
 0x25b   :  { %v410_v53 = vpop.eup %409 }
 0x25c   :  { %v208_v56 = vadd.f32 1.0, %v410_v53  ;;  %v209_v57 = vmul.f32 %v207_v52, %v201_v54 }
 0x25e   :  { %v210_v58 = vmul.f32 %v208_v56, %v202_v55 }
 0x260   :  { %v211_v59 = vpack.c.bf16 %v210_v58, %v209_v57 }
 0x262   :  { %380 = vmatmul.mubr.bf16.vlgmr.msra.gmra.mrb[0].mxu1 %v211_v59 }
 0x335   :  { %v301_v61 = vpop.f32.mrb[0].mxu1 }
 0x336   :  { %v302_v62 = vadd.f32 %v334_v60, %v301_v61  ;;  %v381_v63 = vpop.f32.mrb[1].mxu1 }
 0x337   :  { %v304_v0 = vpop.f32.mrb[2].mxu1 }
 0x338   :  { %308 = vst [vmem:[#allocation8] sm:$0xff] %v302_v62  ;;  %v305_v1 = vadd.f32 %v334_v60, %v304_v0  ;;  %v382_v2 = vpop.f32.mrb[3].mxu1 }
 0x33a   :  { %309 = vst [vmem:[#allocation8 + $0x8] sm:$0xff] %v305_v1 }
 0x33b   :  { %488 = shalt.err (!%p485_p0)
}
 0x33c   :  { %s489_s24 = scalar_lea.hbm %s639_s7, 256 }
 0x33d   :  { %p490_p1 = scmp.ne.s32.totalorder %s639_s7, %s489_s24  ;;  %p493_p2 = scmp.lt.u32.totalorder %s489_s24, %s639_s7 }
 0x33f   :  { %p495_p3 = pnand %p493_p2, %p490_p1 }
 0x341   :  { %498 = shalt.err (!%p495_p3)
}
 0x342   :  { %321 = dma.vmem_to_hbm [thread:$0]  %s316_s21, 256, %s639_s7, [#allocation4], %s509_s3, %s509_s3, %s510_s25  }
 0x343   :  { %503 = dma.done.wait [#allocation4], 256  }
 0x344   :  { %504 = vsyncadd [#allocation4], 4294967040 }
 0x345   :  { %325 = vsyncpa [#allocation3], 1 }
 0x346   :  { %326 = vsyncpa [#allocation6], 1 }
 0x347   :  { %327 = vsyncpa [#allocation4], 1 }

</bundles_post_ra>
